<compile_context>
chip_gen: v6e
topology: v6e:2x2x1
jax: 0.10.0
libtpu: 0.0.40
codegen_flags: <defaults>
</compile_context>

<pallas_src>
import functools

import jax
import jax.numpy as jnp
from jax.experimental import pallas as pl
from jax.experimental.pallas import tpu as pltpu

OUT_DIM = 2
OUT_PAD = 128  # lane-dense output slab; real logits live in columns [:OUT_DIM]


def _gin_kernel(a_ref, x_ref,
                w11_ref, b11_ref, w12_ref, b12_ref,
                w21_ref, b21_ref, w22_ref, b22_ref,
                wl_ref, bl_ref,
                out_ref, h_scratch, *, tm):
    """Two-phase fused GIN forward.

    phase 0: compute layer-1 activations h for this row block -> h_scratch
    phase 1: compute layer-2 + final linear for this row block -> out_ref
    """
    phase = pl.program_id(0)
    i = pl.program_id(1)

    # (tm, N) row block of A_hat = A + I, stored bf16 (exact), promoted to f32.
    a = a_ref[...].astype(jnp.float32)

    @pl.when(phase == 0)
    def _layer1():
        # conv1: MLP1(A_hat @ x), then F.relu
        agg = jnp.dot(a, x_ref[...], preferred_element_type=jnp.float32)
        h = jnp.dot(agg, w11_ref[...], preferred_element_type=jnp.float32) + b11_ref[...]
        h = jnp.maximum(h, 0.0)                       # ReLU inside mlp1
        h = jnp.dot(h, w12_ref[...], preferred_element_type=jnp.float32) + b12_ref[...]
        h = jnp.maximum(h, 0.0)                       # F.relu after conv1
        row = pl.multiple_of(i * tm, tm)
        h_scratch[pl.ds(row, tm), :] = h

    @pl.when(phase == 1)
    def _layer2():
        # conv2: MLP2(A_hat @ h), F.relu, then final Linear (padded to 128 lanes)
        agg = jnp.dot(a, h_scratch[...], preferred_element_type=jnp.float32)
        g = jnp.dot(agg, w21_ref[...], preferred_element_type=jnp.float32) + b21_ref[...]
        g = jnp.maximum(g, 0.0)                       # ReLU inside mlp2
        g = jnp.dot(g, w22_ref[...], preferred_element_type=jnp.float32) + b22_ref[...]
        g = jnp.maximum(g, 0.0)                       # F.relu after conv2
        out_ref[...] = (jnp.dot(g, wl_ref[...], preferred_element_type=jnp.float32)
                        + bl_ref[...])


def gin_forward(x, edge_index, params, *, row_tile=256):
    """x: (N, F) float32, edge_index: (2, E) int.  Returns (N, 2) float32."""
    n, f = x.shape
    h_dim = params["w11"].shape[1]

    # A_hat = A + I: A[i, j] = #edges j -> i, identity folds in the GIN self-term
    # (eps = 0).  Small-integer entries are exact in bf16.
    src = edge_index[0].astype(jnp.int32)
    dst = edge_index[1].astype(jnp.int32)
    adj_plus_i = jnp.eye(n, dtype=jnp.float32).at[dst, src].add(1.0)
    adj_plus_i = adj_plus_i.astype(jnp.bfloat16)

    # Pad final Linear to a lane-dense 128-wide output slab.
    wl, bl = params["wl"], params["bl"]
    wl_pad = jnp.zeros((h_dim, OUT_PAD), jnp.float32).at[:, :wl.shape[1]].set(wl)
    bl_pad = jnp.zeros((1, OUT_PAD), jnp.float32).at[:, :bl.shape[1]].set(bl)

    tm = n if n <= row_tile else row_tile
    assert n % tm == 0, "node count must be divisible by the row tile"
    nb = n // tm

    # BlockSpecs: A_hat / output tiled by rows; x, weights, biases fully resident.
    a_spec = pl.BlockSpec((tm, n), lambda p, i: (i, 0))
    # Output block parks at 0 during phase 0 (never written), real rows in phase 1.
    out_spec = pl.BlockSpec((tm, OUT_PAD), lambda p, i: (p * i, 0))

    def full2d(shape):
        return pl.BlockSpec(shape, lambda p, i: (0, 0))

    weight_args = (params["w11"], params["b11"], params["w12"], params["b12"],
                   params["w21"], params["b21"], params["w22"], params["b22"],
                   wl_pad, bl_pad)
    in_specs = [a_spec, full2d((n, f))] + [full2d(w.shape) for w in weight_args]

    grid_spec = pltpu.PrefetchScalarGridSpec(
        num_scalar_prefetch=0,
        grid=(2, nb),
        in_specs=in_specs,
        out_specs=out_spec,
        scratch_shapes=[pltpu.VMEM((n, h_dim), jnp.float32)],  # full layer-1 acts
    )

    flops = (2 * n * n * f + 2 * n * f * h_dim + 2 * n * h_dim * h_dim       # layer 1
             + 2 * n * n * h_dim + 4 * n * h_dim * h_dim                     # layer 2
             + 2 * n * h_dim * OUT_PAD)                                      # final linear
    bytes_accessed = (n * n * 2 + n * f * 4
                      + sum(int(w.size) for w in weight_args) * 4
                      + n * OUT_PAD * 4)
    cost = pl.CostEstimate(flops=flops, transcendentals=0,
                           bytes_accessed=bytes_accessed)

    out_pad = pl.pallas_call(
        functools.partial(_gin_kernel, tm=tm),
        out_shape=jax.ShapeDtypeStruct((n, OUT_PAD), jnp.float32),
        grid_spec=grid_spec,
        compiler_params=pltpu.CompilerParams(
            # Both axes sequential: phase 1 reads the scratch written by phase 0,
            # and output blocks are revisited across phases.
            dimension_semantics=("arbitrary", "arbitrary"),
            vmem_limit_bytes=64 * 1024 * 1024,
        ),
        cost_estimate=cost,
    )(adj_plus_i, x, *weight_args)

    return out_pad[:, :OUT_DIM]


def init_params(key, num_features, hidden_dim, out_dim=OUT_DIM):
    ks = jax.random.split(key, 10)

    def lin(kw, kb, fan_in, fan_out):
        bound = 1.0 / jnp.sqrt(fan_in)
        w = jax.random.uniform(kw, (fan_in, fan_out), jnp.float32, -bound, bound)
        b = jax.random.uniform(kb, (1, fan_out), jnp.float32, -bound, bound)
        return w, b

    w11, b11 = lin(ks[0], ks[1], num_features, hidden_dim)
    w12, b12 = lin(ks[2], ks[3], hidden_dim, hidden_dim)
    w21, b21 = lin(ks[4], ks[5], hidden_dim, hidden_dim)
    w22, b22 = lin(ks[6], ks[7], hidden_dim, hidden_dim)
    wl, bl = lin(ks[8], ks[9], hidden_dim, out_dim)
    return dict(w11=w11, b11=b11, w12=w12, b12=b12,
                w21=w21, b21=b21, w22=w22, b22=b22, wl=wl, bl=bl)


def gin_reference(x, edge_index, params):
    """Pure-JAX f32 reference (same (A+I) aggregation composition)."""
    n = x.shape[0]
    src = edge_index[0].astype(jnp.int32)
    dst = edge_index[1].astype(jnp.int32)
    a_hat = jnp.eye(n, dtype=jnp.float32).at[dst, src].add(1.0)

    def mlp(z, w_a, b_a, w_b, b_b):
        return jnp.maximum(z @ w_a + b_a, 0.0) @ w_b + b_b

    h = jnp.maximum(mlp(a_hat @ x, params["w11"], params["b11"],
                        params["w12"], params["b12"]), 0.0)
    g = jnp.maximum(mlp(a_hat @ h, params["w21"], params["b21"],
                        params["w22"], params["b22"]), 0.0)
    return g @ params["wl"] + params["bl"]


if __name__ == "__main__":
    key = jax.random.PRNGKey(0)
    k_x, k_e, k_p = jax.random.split(key, 3)

    num_nodes = 16
    num_features = 4
    hidden_dim = 32
    num_edges = 40

    x = jax.random.normal(k_x, (num_nodes, num_features), jnp.float32)
    edge_index = jax.random.randint(k_e, (2, num_edges), 0, num_nodes, jnp.int32)
    params = init_params(k_p, num_features, hidden_dim)

    out = gin_forward(x, edge_index, params)
    out = jax.block_until_ready(out)

    ref = gin_reference(x, edge_index, params)
    assert out.shape == (num_nodes, OUT_DIM)
    assert jnp.allclose(out, ref, atol=1e-3, rtol=1e-3), "mismatch vs reference"

    print("KERNEL_OK")
</pallas_src>

<mosaic_0001>
module attributes {stable_mosaic.version = 11 : i64} {
  func.func @_gin_kernel(%arg0: i32, %arg1: i32, %arg2: memref<16x16xbf16, #tpu.memory_space<vmem>>, %arg3: memref<16x4xf32, #tpu.memory_space<vmem>>, %arg4: memref<4x32xf32, #tpu.memory_space<vmem>>, %arg5: memref<1x32xf32, #tpu.memory_space<vmem>>, %arg6: memref<32x32xf32, #tpu.memory_space<vmem>>, %arg7: memref<1x32xf32, #tpu.memory_space<vmem>>, %arg8: memref<32x32xf32, #tpu.memory_space<vmem>>, %arg9: memref<1x32xf32, #tpu.memory_space<vmem>>, %arg10: memref<32x32xf32, #tpu.memory_space<vmem>>, %arg11: memref<1x32xf32, #tpu.memory_space<vmem>>, %arg12: memref<32x128xf32, #tpu.memory_space<vmem>>, %arg13: memref<1x128xf32, #tpu.memory_space<vmem>>, %arg14: memref<16x128xf32, #tpu.memory_space<vmem>>, %arg15: memref<16x32xf32, #tpu.memory_space<vmem>>) attributes {dimension_semantics = [#tpu.dimension_semantics<arbitrary>, #tpu.dimension_semantics<arbitrary>], iteration_bounds = array<i64: 2, 1>, scalar_prefetch = 0 : i64, scratch_operands = 1 : i64, tpu.core_type = #tpu.core_type<tc>, window_params = [{transform_indices = @transform_0, window_bounds = array<i64: 16, 16>}, {pipeline_mode = #tpu.pipeline_mode<synchronous>, transform_indices = @transform_1, window_bounds = array<i64: 16, 4>}, {pipeline_mode = #tpu.pipeline_mode<synchronous>, transform_indices = @transform_2, window_bounds = array<i64: 4, 32>}, {pipeline_mode = #tpu.pipeline_mode<synchronous>, transform_indices = @transform_3, window_bounds = array<i64: 1, 32>}, {pipeline_mode = #tpu.pipeline_mode<synchronous>, transform_indices = @transform_4, window_bounds = array<i64: 32, 32>}, {pipeline_mode = #tpu.pipeline_mode<synchronous>, transform_indices = @transform_5, window_bounds = array<i64: 1, 32>}, {pipeline_mode = #tpu.pipeline_mode<synchronous>, transform_indices = @transform_6, window_bounds = array<i64: 32, 32>}, {pipeline_mode = #tpu.pipeline_mode<synchronous>, transform_indices = @transform_7, window_bounds = array<i64: 1, 32>}, {pipeline_mode = #tpu.pipeline_mode<synchronous>, transform_indices = @transform_8, window_bounds = array<i64: 32, 32>}, {pipeline_mode = #tpu.pipeline_mode<synchronous>, transform_indices = @transform_9, window_bounds = array<i64: 1, 32>}, {pipeline_mode = #tpu.pipeline_mode<synchronous>, transform_indices = @transform_10, window_bounds = array<i64: 32, 128>}, {pipeline_mode = #tpu.pipeline_mode<synchronous>, transform_indices = @transform_11, window_bounds = array<i64: 1, 128>}, {transform_indices = @transform_12, window_bounds = array<i64: 16, 128>}]} {
    %c0 = arith.constant 0 : index
    %c0_0 = arith.constant 0 : index
    %0 = vector.load %arg2[%c0, %c0_0] : memref<16x16xbf16, #tpu.memory_space<vmem>>, vector<16x16xbf16>
    %1 = arith.extf %0 : vector<16x16xbf16> to vector<16x16xf32>
    %c0_i32 = arith.constant 0 : i32
    %2 = arith.cmpi eq, %arg0, %c0_i32 : i32
    %3 = arith.extui %2 : i1 to i32
    %c0_i32_1 = arith.constant 0 : i32
    %4 = arith.cmpi ne, %3, %c0_i32_1 : i32
    scf.if %4 {
      %c0_3 = arith.constant 0 : index
      %c0_4 = arith.constant 0 : index
      %8 = vector.load %arg3[%c0_3, %c0_4] : memref<16x4xf32, #tpu.memory_space<vmem>>, vector<16x4xf32>
      %cst = arith.constant dense<0.000000e+00> : vector<16x4xf32>
      %9 = tpu.matmul %1, %8, %cst {dimension_numbers = #tpu.dot_dimension_numbers<[1], [0], [0], [1], [0, 0, 1, 1], [], []>} : vector<16x16xf32>, vector<16x4xf32>, vector<16x4xf32> -> vector<16x4xf32>
      %c0_5 = arith.constant 0 : index
      %c0_6 = arith.constant 0 : index
      %10 = vector.load %arg4[%c0_5, %c0_6] : memref<4x32xf32, #tpu.memory_space<vmem>>, vector<4x32xf32>
      %cst_7 = arith.constant dense<0.000000e+00> : vector<16x32xf32>
      %11 = tpu.matmul %9, %10, %cst_7 {dimension_numbers = #tpu.dot_dimension_numbers<[1], [0], [0], [1], [0, 0, 1, 1], [], []>} : vector<16x4xf32>, vector<4x32xf32>, vector<16x32xf32> -> vector<16x32xf32>
      %c0_8 = arith.constant 0 : index
      %c0_9 = arith.constant 0 : index
      %12 = vector.load %arg5[%c0_8, %c0_9] : memref<1x32xf32, #tpu.memory_space<vmem>>, vector<1x32xf32>
      %13 = vector.broadcast %12 : vector<1x32xf32> to vector<16x32xf32>
      %14 = arith.addf %11, %13 : vector<16x32xf32>
      %cst_10 = arith.constant 0.000000e+00 : f32
      %15 = vector.broadcast %cst_10 : f32 to vector<16x32xf32>
      %16 = arith.maximumf %14, %15 : vector<16x32xf32>
      %c0_11 = arith.constant 0 : index
      %c0_12 = arith.constant 0 : index
      %17 = vector.load %arg6[%c0_11, %c0_12] : memref<32x32xf32, #tpu.memory_space<vmem>>, vector<32x32xf32>
      %cst_13 = arith.constant dense<0.000000e+00> : vector<16x32xf32>
      %18 = tpu.matmul %16, %17, %cst_13 {dimension_numbers = #tpu.dot_dimension_numbers<[1], [0], [0], [1], [0, 0, 1, 1], [], []>} : vector<16x32xf32>, vector<32x32xf32>, vector<16x32xf32> -> vector<16x32xf32>
      %c0_14 = arith.constant 0 : index
      %c0_15 = arith.constant 0 : index
      %19 = vector.load %arg7[%c0_14, %c0_15] : memref<1x32xf32, #tpu.memory_space<vmem>>, vector<1x32xf32>
      %20 = vector.broadcast %19 : vector<1x32xf32> to vector<16x32xf32>
      %21 = arith.addf %18, %20 : vector<16x32xf32>
      %cst_16 = arith.constant 0.000000e+00 : f32
      %22 = vector.broadcast %cst_16 : f32 to vector<16x32xf32>
      %23 = arith.maximumf %21, %22 : vector<16x32xf32>
      %c16_i32 = arith.constant 16 : i32
      %24 = arith.muli %arg1, %c16_i32 : i32
      %25 = tpu.assume_multiple %24, 16 : i32
      %26 = arith.index_cast %25 : i32 to index
      %c0_17 = arith.constant 0 : index
      %27 = vector.load %arg15[%26, %c0_17] : memref<16x32xf32, #tpu.memory_space<vmem>>, vector<16x32xf32>
      tpu.vector_store %arg15[%26, %c0_17], %23 {strides = array<i32>} : memref<16x32xf32, #tpu.memory_space<vmem>>, vector<16x32xf32>,
    } else {
    }
    %c1_i32 = arith.constant 1 : i32
    %5 = arith.cmpi eq, %arg0, %c1_i32 : i32
    %6 = arith.extui %5 : i1 to i32
    %c0_i32_2 = arith.constant 0 : i32
    %7 = arith.cmpi ne, %6, %c0_i32_2 : i32
    scf.if %7 {
      %c0_3 = arith.constant 0 : index
      %c0_4 = arith.constant 0 : index
      %8 = vector.load %arg15[%c0_3, %c0_4] : memref<16x32xf32, #tpu.memory_space<vmem>>, vector<16x32xf32>
      %cst = arith.constant dense<0.000000e+00> : vector<16x32xf32>
      %9 = tpu.matmul %1, %8, %cst {dimension_numbers = #tpu.dot_dimension_numbers<[1], [0], [0], [1], [0, 0, 1, 1], [], []>} : vector<16x16xf32>, vector<16x32xf32>, vector<16x32xf32> -> vector<16x32xf32>
      %c0_5 = arith.constant 0 : index
      %c0_6 = arith.constant 0 : index
      %10 = vector.load %arg8[%c0_5, %c0_6] : memref<32x32xf32, #tpu.memory_space<vmem>>, vector<32x32xf32>
      %cst_7 = arith.constant dense<0.000000e+00> : vector<16x32xf32>
      %11 = tpu.matmul %9, %10, %cst_7 {dimension_numbers = #tpu.dot_dimension_numbers<[1], [0], [0], [1], [0, 0, 1, 1], [], []>} : vector<16x32xf32>, vector<32x32xf32>, vector<16x32xf32> -> vector<16x32xf32>
      %c0_8 = arith.constant 0 : index
      %c0_9 = arith.constant 0 : index
      %12 = vector.load %arg9[%c0_8, %c0_9] : memref<1x32xf32, #tpu.memory_space<vmem>>, vector<1x32xf32>
      %13 = vector.broadcast %12 : vector<1x32xf32> to vector<16x32xf32>
      %14 = arith.addf %11, %13 : vector<16x32xf32>
      %cst_10 = arith.constant 0.000000e+00 : f32
      %15 = vector.broadcast %cst_10 : f32 to vector<16x32xf32>
      %16 = arith.maximumf %14, %15 : vector<16x32xf32>
      %c0_11 = arith.constant 0 : index
      %c0_12 = arith.constant 0 : index
      %17 = vector.load %arg10[%c0_11, %c0_12] : memref<32x32xf32, #tpu.memory_space<vmem>>, vector<32x32xf32>
      %cst_13 = arith.constant dense<0.000000e+00> : vector<16x32xf32>
      %18 = tpu.matmul %16, %17, %cst_13 {dimension_numbers = #tpu.dot_dimension_numbers<[1], [0], [0], [1], [0, 0, 1, 1], [], []>} : vector<16x32xf32>, vector<32x32xf32>, vector<16x32xf32> -> vector<16x32xf32>
      %c0_14 = arith.constant 0 : index
      %c0_15 = arith.constant 0 : index
      %19 = vector.load %arg11[%c0_14, %c0_15] : memref<1x32xf32, #tpu.memory_space<vmem>>, vector<1x32xf32>
      %20 = vector.broadcast %19 : vector<1x32xf32> to vector<16x32xf32>
      %21 = arith.addf %18, %20 : vector<16x32xf32>
      %cst_16 = arith.constant 0.000000e+00 : f32
      %22 = vector.broadcast %cst_16 : f32 to vector<16x32xf32>
      %23 = arith.maximumf %21, %22 : vector<16x32xf32>
      %c0_17 = arith.constant 0 : index
      %c0_18 = arith.constant 0 : index
      %24 = vector.load %arg12[%c0_17, %c0_18] : memref<32x128xf32, #tpu.memory_space<vmem>>, vector<32x128xf32>
      %cst_19 = arith.constant dense<0.000000e+00> : vector<16x128xf32>
      %25 = tpu.matmul %23, %24, %cst_19 {dimension_numbers = #tpu.dot_dimension_numbers<[1], [0], [0], [1], [0, 0, 1, 1], [], []>} : vector<16x32xf32>, vector<32x128xf32>, vector<16x128xf32> -> vector<16x128xf32>
      %c0_20 = arith.constant 0 : index
      %c0_21 = arith.constant 0 : index
      %26 = vector.load %arg13[%c0_20, %c0_21] : memref<1x128xf32, #tpu.memory_space<vmem>>, vector<1x128xf32>
      %27 = vector.broadcast %26 : vector<1x128xf32> to vector<16x128xf32>
      %28 = arith.addf %25, %27 : vector<16x128xf32>
      %c0_22 = arith.constant 0 : index
      %c0_23 = arith.constant 0 : index
      %29 = vector.load %arg14[%c0_22, %c0_23] : memref<16x128xf32, #tpu.memory_space<vmem>>, vector<16x128xf32>
      tpu.vector_store %arg14[%c0_22, %c0_23], %28 {strides = array<i32>} : memref<16x128xf32, #tpu.memory_space<vmem>>, vector<16x128xf32>,
    } else {
    }
    return
  }
  func.func @transform_0(%arg0: i32, %arg1: i32) -> (i32, i32) {
    %c0_i32 = arith.constant 0 : i32
    %c0_i32_0 = arith.constant 0 : i32
    return %arg1, %c0_i32 : i32, i32
  }
  func.func @transform_1(%arg0: i32, %arg1: i32) -> (i32, i32) {
    %c0_i32 = arith.constant 0 : i32
    %c0_i32_0 = arith.constant 0 : i32
    %c0_i32_1 = arith.constant 0 : i32
    return %c0_i32, %c0_i32_0 : i32, i32
  }
  func.func @transform_2(%arg0: i32, %arg1: i32) -> (i32, i32) {
    %c0_i32 = arith.constant 0 : i32
    %c0_i32_0 = arith.constant 0 : i32
    %c0_i32_1 = arith.constant 0 : i32
    return %c0_i32, %c0_i32_0 : i32, i32
  }
  func.func @transform_3(%arg0: i32, %arg1: i32) -> (i32, i32) {
    %c0_i32 = arith.constant 0 : i32
    %c0_i32_0 = arith.constant 0 : i32
    %c0_i32_1 = arith.constant 0 : i32
    return %c0_i32, %c0_i32_0 : i32, i32
  }
  func.func @transform_4(%arg0: i32, %arg1: i32) -> (i32, i32) {
    %c0_i32 = arith.constant 0 : i32
    %c0_i32_0 = arith.constant 0 : i32
    %c0_i32_1 = arith.constant 0 : i32
    return %c0_i32, %c0_i32_0 : i32, i32
  }
  func.func @transform_5(%arg0: i32, %arg1: i32) -> (i32, i32) {
    %c0_i32 = arith.constant 0 : i32
    %c0_i32_0 = arith.constant 0 : i32
    %c0_i32_1 = arith.constant 0 : i32
    return %c0_i32, %c0_i32_0 : i32, i32
  }
  func.func @transform_6(%arg0: i32, %arg1: i32) -> (i32, i32) {
    %c0_i32 = arith.constant 0 : i32
    %c0_i32_0 = arith.constant 0 : i32
    %c0_i32_1 = arith.constant 0 : i32
    return %c0_i32, %c0_i32_0 : i32, i32
  }
  func.func @transform_7(%arg0: i32, %arg1: i32) -> (i32, i32) {
    %c0_i32 = arith.constant 0 : i32
    %c0_i32_0 = arith.constant 0 : i32
    %c0_i32_1 = arith.constant 0 : i32
    return %c0_i32, %c0_i32_0 : i32, i32
  }
  func.func @transform_8(%arg0: i32, %arg1: i32) -> (i32, i32) {
    %c0_i32 = arith.constant 0 : i32
    %c0_i32_0 = arith.constant 0 : i32
    %c0_i32_1 = arith.constant 0 : i32
    return %c0_i32, %c0_i32_0 : i32, i32
  }
  func.func @transform_9(%arg0: i32, %arg1: i32) -> (i32, i32) {
    %c0_i32 = arith.constant 0 : i32
    %c0_i32_0 = arith.constant 0 : i32
    %c0_i32_1 = arith.constant 0 : i32
    return %c0_i32, %c0_i32_0 : i32, i32
  }
  func.func @transform_10(%arg0: i32, %arg1: i32) -> (i32, i32) {
    %c0_i32 = arith.constant 0 : i32
    %c0_i32_0 = arith.constant 0 : i32
    %c0_i32_1 = arith.constant 0 : i32
    return %c0_i32, %c0_i32_0 : i32, i32
  }
  func.func @transform_11(%arg0: i32, %arg1: i32) -> (i32, i32) {
    %c0_i32 = arith.constant 0 : i32
    %c0_i32_0 = arith.constant 0 : i32
    %c0_i32_1 = arith.constant 0 : i32
    return %c0_i32, %c0_i32_0 : i32, i32
  }
  func.func @transform_12(%arg0: i32, %arg1: i32) -> (i32, i32) {
    %0 = arith.muli %arg0, %arg1 : i32
    %c0_i32 = arith.constant 0 : i32
    %c0_i32_0 = arith.constant 0 : i32
    return %0, %c0_i32 : i32, i32
  }
}

</mosaic_0001>

<bundles_post_ra>
// kernel: tpu_custom_call.1
= control target key start
LH: loop header
LB: loop body
LE: loop exit
PB: predicated region body
PF: predicated region fallthrough
CT: control target
= control target key end

     0   :  { %s2031_s0 = inlined_call_operand.hbm [shape: bf16[16,16], index: 0, kind: input, shape index: {}]   ;;  %s2032_s1 = inlined_call_operand.vmem [shape: f32[16,4], index: 1, kind: input, shape index: {}]   ;;  %s2033_s2 = inlined_call_operand.hbm [shape: f32[4,32], index: 2, kind: input, shape index: {}]   ;;  %s2034_s3 = inlined_call_operand.vmem [shape: f32[1,32], index: 3, kind: input, shape index: {}]   ;;  %s2035_s4 = inlined_call_operand.hbm [shape: f32[32,32], index: 4, kind: input, shape index: {}]   ;;  %s2036_s5 = inlined_call_operand.vmem [shape: f32[1,32], index: 5, kind: input, shape index: {}]   ;;  %s2037_s6 = inlined_call_operand.hbm [shape: f32[32,32], index: 6, kind: input, shape index: {}]   ;;  %s2038_s7 = inlined_call_operand.hbm [shape: f32[1,32], index: 7, kind: input, shape index: {}]   ;;  %s2039_s8 = inlined_call_operand.vmem [shape: f32[32,32], index: 8, kind: input, shape index: {}]   ;;  %s2040_s9 = inlined_call_operand.vmem [shape: f32[1,32], index: 9, kind: input, shape index: {}]   ;;  %s2041_s10 = inlined_call_operand.hbm [shape: f32[32,128], index: 10, kind: input, shape index: {}]   ;;  %s2042_s11 = inlined_call_operand.vmem [shape: f32[1,128], index: 11, kind: input, shape index: {}]   ;;  %s2043_s12 = inlined_call_operand.hbm [shape: f32[16,128], index: 12, kind: output, shape index: {}]  }
   0x1   :  { %2052 = sst [smem:[#allocation20_spill]] %s2033_s2 }
   0x2   :  { %17 = vsyncpa [#allocation4], 0 }
   0x3   :  { %18 = vsyncpa [#allocation7], 0 }
   0x4   :  { %19 = vsyncpa [#allocation10], 0 }
   0x5   :  { %20 = vsyncpa [#allocation13], 0 }
   0x6   :  { %21 = vsyncpa [#allocation5], 0 }
   0x7   :  { %23 = vsyncpa [#allocation5 + $0x1], 0  ;;  %s1845_s21 = smov 0   ;;  %s1847_s22 = smov 0  }
   0x8   :  { %s1849_s23 = smov 0  }
   0x9 LB: > { %s1767_s24 = smov [#allocation6]   ;;  %s2047_s26 = sadd.s32 4294967295, %s1765_s23   ;;  %s1765_s23 = sphi %s1849_s23, %s29_s23   ;;  %s1761_s22 = sphi %s1847_s22, %s2066_s22   ;;  %s1757_s21 = sphi %s1845_s21, %s2065_s21  }
   0xa   : > { %s363_s25 = sshll.u32 %s1767_s24, 4  ;;  %p1298_p0 = scmp.ge.s32.totalorder %s1765_s23, 1  ;;  %s364_s25 = int_to_ptr.vmem [resolvable:$true] %s363_s25 }
   0xb   : > { %p331_p1 = scmp.lt.s32.totalorder %s1765_s23, 3  ;;  %p1866_p2 = scmp.eq.s32.totalorder %s2047_s26, 0 }
   0xc   : > { %s1768_s30 = smov [#allocation9]   ;;  %s1554_s16 = scalar_lea.vmem %s364_s25, 64 }
   0xd   : > { %s2053_s28 = scalar_select %p1866_p2, 1, 0 }
   0xe   : > { %p1870_p3 = pnand %p1298_p0, %p331_p1  ;;  %s392_s13 = sshll.u32 %s1768_s30, 4  ;;  %s393_s13 = int_to_ptr.vmem [resolvable:$true] %s392_s13 }
   0xf   : > { %p1555_p7 = scmp.ne.s32.totalorder %s364_s25, %s1554_s16  ;;  %p1562_p10 = scmp.lt.s32.totalorder %s364_s25, %s364_s25 }
  0x10   : > { %s2054_s29 = scalar_select %p1870_p3, 1, 0 }
  0x11   : > { %p1468_p4 = pneg %p1870_p3  ;;  %p1563_p11 = scmp.lt.s32.totalorder %s1554_s16, %s1554_s16 }
  0x13   : > { %p1878_p5 = pnand %p1866_p2, %p1468_p4  ;;  %p1564_p12 = por %p1563_p11, %p1562_p10 }
  0x15   : > { %p1884_p6 = pneg %p1878_p5 }
  0x17   : > { %p1557_p8 = pnand %p1555_p7, %p1884_p6 }
  0x19   : > { %p1558_p9 = pneg %p1557_p8 }
  0x1b   : > { %p1565_p13 = pnand %p1564_p12, %p1558_p9 }
  0x1d   : > { %1568 = shalt.err (!%p1565_p13)
}
  0x1e   : > { %s2057_s2 = sld [smem:[#allocation20_spill]]  ;;  %s1580_s19 = scalar_lea.vmem %s393_s13, 512 }
  0x1f   : > { %p1581_p0 = scmp.ne.s32.totalorder %s393_s13, %s1580_s19  ;;  %p1588_p2 = scmp.lt.s32.totalorder %s393_s13, %s393_s13 }
  0x20   : > { %p1589_p7 = scmp.lt.s32.totalorder %s1580_s19, %s1580_s19 }
  0x21   : > { %p1583_p1 = pnand %p1581_p0, %p1884_p6 }
  0x22   : > { %p1590_p8 = por %p1589_p7, %p1588_p2 }
  0x23   : > { %p1584_p4 = pneg %p1583_p1 }
  0x24   : > { %1474 = dma.hbm_to_vmem [thread:$0]  (!%p1878_p5), %s2057_s2, 64, %s364_s25, [#allocation7]  }
  0x25   : > { %p1591_p3 = pnand %p1590_p8, %p1584_p4 }
  0x27   : > { %1594 = shalt.err (!%p1591_p3)
}
  0x28   : > { %s2048_s20 = smov 128   ;;  %s2050_s24 = smov 8  }
  0x29   : > { %1480 = dma.hbm_to_vmem [thread:$0]  (!%p1878_p5), %s2037_s6, 512, %s393_s13, [#allocation10], %s2048_s20, %s2048_s20, %s2050_s24  }
  0x2a   : > { %s41_s16 = sadd.s32 1, %s1761_s22  ;;  %s1771_s17 = smov [#allocation3]  }
  0x2b   : > { %p43_p9 = scmp.ge.s32.totalorder %s41_s16, 2  ;;  %s346_s18 = sshll.u32 %s1771_s17, 4  ;;  %s347_s18 = int_to_ptr.vmem [resolvable:$true] %s346_s18 }
  0x2c   : > { %s1606_s19 = scalar_lea.vmem %s347_s18, 128  ;;  %p1614_p11 = scmp.lt.s32.totalorder %s347_s18, %s347_s18 }
  0x2d   : > { %s2068_s16 = smov (%p43_p9, %s41_s16), 0  ;;  %p1607_p2 = scmp.ne.s32.totalorder %s347_s18, %s1606_s19 }
  0x2e   : > { %p1615_p12 = scmp.lt.s32.totalorder %s1606_s19, %s1606_s19 }
  0x2f   : > { %p1609_p3 = pnand %p1607_p2, %p1884_p6 }
  0x30   : > { %p1616_p13 = por %p1615_p12, %p1614_p11 }
  0x31   : > { %p1610_p10 = pneg %p1609_p3 }
  0x33   : > { %p1617_p0 = pnand %p1616_p13, %p1610_p10 }
  0x35   : > { %1620 = shalt.err (!%p1617_p0)
}
  0x36   : > { %s1772_s27 = smov 64   ;;  %s1773_s13 = smov 4  }
  0x37   : > { %1471 = dma.hbm_to_vmem [thread:$0]  (!%p1878_p5), %s2031_s0, 128, %s347_s18, [#allocation4], %s1772_s27, %s1772_s27, %s1773_s13  }
  0x38   : > { %s1774_s17 = smov [#allocation8]   ;;  %s1775_s20 = smov [#allocation11]  }
  0x39   : > { %s376_s26 = sshll.u32 %s1774_s17, 4  ;;  %s406_s24 = sshll.u32 %s1775_s20, 4  ;;  %s377_s26 = int_to_ptr.vmem [resolvable:$true] %s376_s26  ;;  %s407_s24 = int_to_ptr.vmem [resolvable:$true] %s406_s24 }
  0x3a   : > { %s1632_s2 = scalar_lea.vmem %s377_s26, 512  ;;  %p1640_p8 = scmp.lt.s32.totalorder %s377_s26, %s377_s26 }
  0x3b   : > { %p1633_p1 = scmp.ne.s32.totalorder %s377_s26, %s1632_s2  ;;  %p1641_p9 = scmp.lt.s32.totalorder %s1632_s2, %s1632_s2 }
  0x3d   : > { %p1635_p4 = pnand %p1633_p1, %p1884_p6  ;;  %p1642_p2 = por %p1641_p9, %p1640_p8 }
  0x3f   : > { %p1636_p7 = pneg %p1635_p4 }
  0x41   : > { %p1643_p3 = pnand %p1642_p2, %p1636_p7 }
  0x43   : > { %1646 = shalt.err (!%p1643_p3)
}
  0x44   : > { %s2058_s19 = smov 8   ;;  %s2059_s25 = smov 128  }
  0x45   : > { %1477 = dma.hbm_to_vmem [thread:$0]  (!%p1878_p5), %s2035_s4, 512, %s377_s26, [#allocation7], %s2059_s25, %s2059_s25, %s2058_s19  }
  0x46   : > { %s1658_s20 = scalar_lea.vmem %s407_s24, 16  ;;  %s1665_s2 = scalar_lea.vmem %s407_s24, 32 }
  0x47   : > { %p1659_p10 = scmp.ne.s32.totalorder %s407_s24, %s1658_s20  ;;  %p1666_p13 = scmp.lt.s32.totalorder %s407_s24, %s407_s24 }
  0x48   : > { %p1667_p0 = scmp.lt.s32.totalorder %s1665_s2, %s1658_s20 }
  0x49   : > { %p1661_p11 = pnand %p1659_p10, %p1884_p6 }
  0x4a   : > { %p1668_p1 = por %p1667_p0, %p1666_p13 }
  0x4b   : > { %p1662_p12 = pneg %p1661_p11 }
  0x4d   : > { %p1669_p4 = pnand %p1668_p1, %p1662_p12 }
  0x4f   : > { %1672 = shalt.err (!%p1669_p4)
}
  0x50   : > { %1483 = dma.hbm_to_vmem [thread:$0]  (!%p1878_p5), %s2038_s7, 16, %s407_s24, [#allocation10]  }
  0x51   : > { %s1776_s26 = smov [#allocation12]  }
  0x52   : > { %s422_s17 = sshll.u32 %s1776_s26, 4  ;;  %s423_s17 = int_to_ptr.vmem [resolvable:$true] %s422_s17 }
  0x53   : > { %s1684_s27 = scalar_lea.vmem %s423_s17, 512  ;;  %p1692_p2 = scmp.lt.s32.totalorder %s423_s17, %s423_s17 }
  0x54   : > { %p1685_p7 = scmp.ne.s32.totalorder %s423_s17, %s1684_s27  ;;  %p1693_p3 = scmp.lt.s32.totalorder %s1684_s27, %s1684_s27 }
  0x56   : > { %p1687_p8 = pnand %p1685_p7, %p1884_p6  ;;  %p1694_p10 = por %p1693_p3, %p1692_p2 }
  0x58   : > { %p1688_p9 = pneg %p1687_p8 }
  0x5a   : > { %p1695_p11 = pnand %p1694_p10, %p1688_p9 }
  0x5c   : > { %1698 = shalt.err (!%p1695_p11)
}
  0x5d   : > { %1486 = dma.hbm_to_vmem [thread:$0]  (!%p1878_p5), %s2041_s10, 512, %s423_s17, [#allocation13], %s2059_s25, %s2059_s25, %s2058_s19  }
  0x5e   : > { %p2060_p12 = scmp.ne.s32.totalorder %s2054_s29, 0 }
  0x5f   : > { %p2061_p6 = scmp.ne.s32.totalorder (!%p2060_p12), %s2053_s28, 0 }
  0x60   : > { %441 = sbr.rel (%p2060_p12) target bundleno = 1536 (0x600), region = 68 }
  0x65   : > { %1736 = dma.done.wait (%p2061_p6), [#allocation4], 128  }
  0x66   : > { %1738 = vsyncadd (%p2061_p6), [#allocation4], 4294967168 }
  0x67   : > { %1740 = dma.done.wait (%p2061_p6), [#allocation7], 576  }
  0x68   : > { %1742 = vsyncadd (%p2061_p6), [#allocation7], 4294966720 }
  0x69   : > { %1744 = dma.done.wait (%p2061_p6), [#allocation10], 528  }
  0x6a   : > { %1746 = vsyncadd (%p2061_p6), [#allocation10], 4294966768 }
  0x6b   : > { %1748 = dma.done.wait (%p2061_p6), [#allocation13], 512  }
  0x6c   : > { %1750 = vsyncadd (%p2061_p6), [#allocation13], 4294966784  ;;  %v1960_v0 = vld [vmem:[#allocation3] sm:$0xff]   ;;  %p1312_p5 = scmp.ne.s32.totalorder %s1757_s21, 0 }
  0x6d   : > { %v1340_v1 = vunpack.c.l.bf16 %v1960_v0  ;;  %v1341_v2 = vunpack.c.h.bf16 %v1960_v0 }
  0x6e   : > { %508 = sbr.rel (%p1312_p5) target bundleno = 716 (0x2cc), region = 96 }
  0x73   : > { %v510_v3 = vld [vmem:[%s2032_s1 + $0x8] sm:$0xff]  ;;  %v509_v4 = vld [vmem:[%s2032_s1] sm:$0xff]  ;;  %vm511_vm0 = vcmask 130048   ;;  %v593_v5 = vld [vmem:[#allocation6] sm:$0xf]  ;;  %vm608_vm1 = vcmask 1043456  }
  0x74   : > { %1377 = vmatprep.subr.mxu0 %v510_v3  ;;  %1381 = vmatprep.mubr.msk.f32.mxu0 %vm511_vm0, %v1340_v1  ;;  %vm601_vm2 = vcmask 31744   ;;  %v692_v8 = vld [vmem:[#allocation8 + $0x18] sm:$0xff]  ;;  %v691_v9 = vld [vmem:[#allocation8 + $0x10] sm:$0xff]  ;;  %v690_v10 = vld [vmem:[#allocation8 + $0x8] sm:$0xff]  ;;  %vm700_vm3 = vcmask 261120  }
  0x75   : > { %1378 = vmatpush3.msra.mxu0 %v510_v3  ;;  %1389 = vmatprep.subr.mxu1 %v692_v8  ;;  %v689_v11 = vld [vmem:[#allocation8] sm:$0xff] }
  0x76   : > { %1379 = vmatprep.subr.mxu0 %v509_v4  ;;  %1390 = vmatpush3.msra.mxu1 %v692_v8  ;;  %v1315_v12 = vld [vmem:[%s2034_s3] ss:$0 sm:$0xff] }
  0x77   : > { %1380 = vmatpush3.msra.mxu0 %v509_v4  ;;  %1391 = vmatprep.subr.mxu1 %v691_v9  ;;  %v1319_v19 = vld [vmem:[%s2036_s5] ss:$0 sm:$0xff] }
  0x78   : > { %1382 = vmatmul.mubr.msk.f32.vlgmr.msra.gmra.mxu0 %vm511_vm0, %v1341_v2  ;;  %1384 = vmatprep.subr.msk.mxu0 %vm608_vm1, %v593_v5 }
  0x79   : > { %1385 = vmatpush3.msk.msra.mxu0 %vm608_vm1, %v593_v5  ;;  %1392 = vmatpush3.msra.mxu1 %v691_v9 }
  0x7a   : > { %1393 = vmatprep.subr.mxu1 %v690_v10 }
  0x7b   : > { %1394 = vmatpush3.msra.mxu1 %v690_v10 }
  0x7c   : > { %1395 = vmatprep.subr.mxu1 %v689_v11 }
  0x7d   : > { %1396 = vmatpush3.msra.mxu1 %v689_v11 }
 0x138   : > { %v1383_v6 = vpop.f32.mrf.mxu0 }
 0x13a   : > { %v584_v7 = vpop.f32.mrf.mxu0 }
 0x13b   : > { %1386 = vmatprep.mubr.msk.f32.mxu0 %vm601_vm2, %v584_v7 }
 0x13c   : > { %1387 = vmatmul.mubr.msk.f32.vlgmr.msra.gmra.mxu0 %vm601_vm2, %v1383_v6 }
 0x1fc   : > { %v1388_v13 = vpop.f32.mrf.mxu0 }
 0x1fd   : > { %v684_v14 = vadd.f32 %v1388_v13, %v1315_v12 }
 0x1fe   : > { %v678_v15 = vpop.f32.mrf.mxu0 }
 0x1ff   : > { %v679_v16 = vadd.f32 %v1315_v12, %v678_v15  ;;  %v688_v18 = vmax.f32 %v684_v14, 0.0 }
 0x201   : > { %v687_v17 = vmax.f32 %v679_v16, 0.0 }
 0x203   : > { %1397 = vmatprep.mubr.msk.f32.mxu1 %vm700_vm3, %v687_v17 }
 0x204   : > { %1398 = vmatmul.mubr.msk.f32.vlgmr.msra.gmra.mxu1 %vm700_vm3, %v688_v18 }
 0x2c4   : > { %v1399_v20 = vpop.f32.mrf.mxu1 }
 0x2c5   : > { %v779_v21 = vadd.f32 %v1399_v20, %v1319_v19 }
 0x2c6   : > { %v773_v22 = vpop.f32.mrf.mxu1 }
 0x2c7   : > { %v783_v23 = vmax.f32 %v779_v21, 0.0  ;;  %v774_v24 = vadd.f32 %v1319_v19, %v773_v22 }
 0x2c9   : > { %787 = vst.msk [vmem:[#allocation2 + $0x8] sm:$0xff] %vm700_vm3, %v783_v23  ;;  %v782_v25 = vmax.f32 %v774_v24, 0.0 }
 0x2cb   : > { %786 = vst.msk [vmem:[#allocation2] sm:$0xff] %vm700_vm3, %v782_v25 }
 0x2cc PF: > { %p1322_p13 = scmp.ne.s32.totalorder %s1757_s21, 1 }
 0x2ce   : > { %791 = sbr.rel (%p1322_p13) target bundleno = 1522 (0x5f2), region = 100 }
 0x2d3   : > { %v793_v26 = vld [vmem:[#allocation2 + $0x8] sm:$0xff]  ;;  %v792_v27 = vld [vmem:[#allocation2] sm:$0xff]  ;;  %vm794_vm4 = vcmask 130048   ;;  %v879_v28 = vld [vmem:[#allocation9 + $0x18] sm:$0xff]  ;;  %vm887_vm5 = vcmask 261120  }
 0x2d4   : > { %1400 = vmatprep.subr.mxu0 %v793_v26  ;;  %1404 = vmatprep.mubr.msk.f32.mxu0 %vm794_vm4, %v1340_v1  ;;  %v878_v29 = vld [vmem:[#allocation9 + $0x10] sm:$0xff]  ;;  %v877_v30 = vld [vmem:[#allocation9 + $0x8] sm:$0xff]  ;;  %v876_v31 = vld [vmem:[#allocation9] sm:$0xff] }
 0x2d5   : > { %1401 = vmatpush3.msra.mxu0 %v793_v26  ;;  %1407 = vmatprep.subr.mxu1 %v879_v28  ;;  %v974_v34 = vld [vmem:[%s2039_s8 + $0x18] sm:$0xff]  ;;  %v973_v35 = vld [vmem:[%s2039_s8 + $0x10] sm:$0xff]  ;;  %v972_v36 = vld [vmem:[%s2039_s8 + $0x8] sm:$0xff] }
 0x2d6   : > { %1402 = vmatprep.subr.mxu0 %v792_v27  ;;  %1408 = vmatpush3.msra.mxu1 %v879_v28  ;;  %v971_v37 = vld [vmem:[%s2039_s8] sm:$0xff]  ;;  %v1325_v38 = vld [vmem:[#allocation11] ss:$0 sm:$0xff]  ;;  %v1067_v46 = vld [vmem:[#allocation12 + $0x10] sm:$0xff] }
 0x2d7   : > { %1403 = vmatpush3.msra.mxu0 %v792_v27  ;;  %1409 = vmatprep.subr.mxu1 %v878_v29  ;;  %v1068_v45 = vld [vmem:[#allocation12 + $0x18] sm:$0xff]  ;;  %v1066_v47 = vld [vmem:[#allocation12 + $0x8] sm:$0xff]  ;;  %v1065_v48 = vld [vmem:[#allocation12] sm:$0xff] }
 0x2d8   : > { %1405 = vmatmul.mubr.msk.f32.vlgmr.msra.gmra.mxu0 %vm794_vm4, %v1341_v2  ;;  %1410 = vmatpush3.msra.mxu1 %v878_v29  ;;  %v1328_v49 = vld [vmem:[%s2040_s9] ss:$0 sm:$0xff] }
 0x2d9   : > { %1411 = vmatprep.subr.mxu1 %v877_v30  ;;  %1418 = vmatprep.subr.mxu0 %v974_v34  ;;  %v1331_v56 = vld [vmem:[%s2042_s11] ss:$0 sm:$0xff] }
 0x2da   : > { %1412 = vmatpush3.msra.mxu1 %v877_v30  ;;  %1419 = vmatpush3.msra.mxu0 %v974_v34 }
 0x2db   : > { %1413 = vmatprep.subr.mxu1 %v876_v31  ;;  %1420 = vmatprep.subr.mxu0 %v973_v35 }
 0x2dc   : > { %1414 = vmatpush3.msra.mxu1 %v876_v31  ;;  %1421 = vmatpush3.msra.mxu0 %v973_v35 }
 0x2dd   : > { %1422 = vmatprep.subr.mxu0 %v972_v36  ;;  %1429 = vmatprep.subr.mxu1 %v1068_v45 }
 0x2de   : > { %1423 = vmatpush3.msra.mxu0 %v972_v36 }
 0x2df   : > { %1424 = vmatprep.subr.mxu0 %v971_v37 }
 0x2e0   : > { %1425 = vmatpush3.msra.mxu0 %v971_v37 }
 0x398   : > { %v1406_v32 = vpop.f32.mrf.mxu0 }
 0x39a   : > { %v867_v33 = vpop.f32.mrf.mxu0 }
 0x39b   : > { %1415 = vmatprep.mubr.msk.f32.mxu1 %vm887_vm5, %v867_v33 }
 0x39c   : > { %1416 = vmatmul.mubr.msk.f32.vlgmr.msra.gmra.mxu1 %vm887_vm5, %v1406_v32 }
 0x39d   : > { %1430 = vmatpush3.msra.mxu1 %v1068_v45 }
 0x39e   : > { %1431 = vmatprep.subr.mxu1 %v1067_v46 }
 0x39f   : > { %1432 = vmatpush3.msra.mxu1 %v1067_v46 }
 0x3a0   : > { %1433 = vmatprep.subr.mxu1 %v1066_v47 }
 0x3a1   : > { %1434 = vmatpush3.msra.mxu1 %v1066_v47 }
 0x3a2   : > { %1435 = vmatprep.subr.mxu1 %v1065_v48 }
 0x3a3   : > { %1436 = vmatpush3.msra.mxu1 %v1065_v48 }
 0x45c   : > { %v1417_v39 = vpop.f32.mrf.mxu1 }
 0x45d   : > { %v966_v40 = vadd.f32 %v1417_v39, %v1325_v38 }
 0x45e   : > { %v960_v41 = vpop.f32.mrf.mxu1 }
 0x45f   : > { %v961_v42 = vadd.f32 %v1325_v38, %v960_v41  ;;  %v970_v44 = vmax.f32 %v966_v40, 0.0 }
 0x461   : > { %v969_v43 = vmax.f32 %v961_v42, 0.0 }
 0x463   : > { %1426 = vmatprep.mubr.msk.f32.mxu0 %vm887_vm5, %v969_v43 }
 0x464   : > { %1427 = vmatmul.mubr.msk.f32.vlgmr.msra.gmra.mxu0 %vm887_vm5, %v970_v44 }
 0x524   : > { %v1428_v50 = vpop.f32.mrf.mxu0 }
 0x525   : > { %v1060_v51 = vadd.f32 %v1428_v50, %v1328_v49 }
 0x526   : > { %v1054_v52 = vpop.f32.mrf.mxu0 }
 0x527   : > { %v1055_v53 = vadd.f32 %v1328_v49, %v1054_v52  ;;  %v1064_v55 = vmax.f32 %v1060_v51, 0.0 }
 0x529   : > { %v1063_v54 = vmax.f32 %v1055_v53, 0.0 }
 0x52b   : > { %1437 = vmatprep.mubr.msk.f32.mxu1 %vm887_vm5, %v1063_v54 }
 0x52c   : > { %1438 = vmatmul.mubr.msk.f32.vlgmr.msra.gmra.mxu1 %vm887_vm5, %v1064_v55 }
 0x5ec   : > { %v1439_v57 = vpop.f32.mrf.mxu1 }
 0x5ed   : > { %v1154_v58 = vadd.f32 %v1439_v57, %v1331_v56 }
 0x5ee   : > { %v1148_v59 = vpop.f32.mrf.mxu1 }
 0x5ef   : > { %1158 = vst [vmem:[#allocation14 + $0x8] sm:$0xff] %v1154_v58  ;;  %v1149_v60 = vadd.f32 %v1331_v56, %v1148_v59 }
 0x5f1   : > { %1157 = vst [vmem:[#allocation14] sm:$0xff] %v1149_v60 }
 0x5f2 PF: > { %s2062_s28 = sadd.s32 4294967295, %s1765_s23   ;;  %s1777_s20 = smov [#allocation14]  }
 0x5f3   : > { %p2008_p0 = scmp.eq.s32.totalorder %s2062_s28, 1  ;;  %s1174_s2 = sshll.u32 %s1777_s20, 4  ;;  %s1175_s2 = int_to_ptr.vmem [resolvable:$true] %s1174_s2 }
 0x5f4   : > { %s1699_s21 = scalar_lea.vmem %s1175_s2, 256  ;;  %s1705_s13 = scalar_lea.vmem %s1175_s2, 512 }
 0x5f5   : > { %p1700_p1 = scmp.ne.s32.totalorder %s1175_s2, %s1699_s21  ;;  %p1706_p8 = scmp.lt.s32.totalorder %s1175_s2, %s1175_s2 }
 0x5f6   : > { %p1707_p9 = scmp.lt.s32.totalorder %s1705_s13, %s1699_s21 }
 0x5f7   : > { %p1701_p4 = pnand %p1700_p1, %p2008_p0 }
 0x5f8   : > { %p1708_p2 = por %p1707_p9, %p1706_p8 }
 0x5f9   : > { %p1702_p7 = pneg %p1701_p4 }
 0x5fb   : > { %p1709_p3 = pnand %p1708_p2, %p1702_p7 }
 0x5fd   : > { %1712 = shalt.err (!%p1709_p3)
}
 0x5fe   : > { %s1778_s30 = smov 128   ;;  %s1779_s26 = smov 8  }
 0x5ff   : > { %1465 = dma.vmem_to_hbm [thread:$0]  (%p2008_p0), %s1175_s2, 256, %s2043_s12, [#allocation5], %s1778_s30, %s1778_s30, %s1779_s26  }
 0x600 PF: > { %p1504_p10 = scmp.ge.s32.totalorder %s1765_s23, 2  ;;  %s2064_s18 = sadd.s32 4294967294, %s1765_s23  }
 0x601   : > { %p1505_p11 = scmp.eq.s32.totalorder %s2064_s18, 1 }
 0x603   : > { %p1488_p12 = pnand %p1505_p11, %p1504_p10 }
 0x605   : > { %p1489_p6 = pneg %p1488_p12 }
 0x607   : > { %1752 = dma.done.wait (%p1489_p6), [#allocation5], 256  }
 0x608   : > { %1754 = vsyncadd (%p1489_p6), [#allocation5], 4294967040  ;;  %s29_s23 = sadd.s32 1, %s1765_s23   ;;  %s2065_s21 = smov %s1761_s22 }
 0x609   : > { %p26_p5 = scmp.ge.s32.totalorder %s29_s23, 4   ;;  %s2066_s22 = smov %s2068_s16 }
 0x60b   :  { %28 = sbr.rel (!%p26_p5) target bundleno = 9 (0x9), region = 135 }
 0x610   :  { %1195 = vsyncpa [#allocation4], 1 }
 0x611   :  { %1197 = vsyncpa [#allocation4 + $0x1], 1 }
 0x612   :  { %1198 = vsyncpa [#allocation7], 1 }
 0x613   :  { %1199 = vsyncpa [#allocation10], 1 }
 0x614   :  { %1200 = vsyncpa [#allocation13], 1 }
 0x615   :  { %1201 = vsyncpa [#allocation5], 1 }
 0x616   :  { %1203 = vsyncpa [#allocation5 + $0x1], 1 }

</bundles_post_ra>
